<compile_context>
chip_gen: v7x
topology: tpu7x:2x2x1
jax: 0.10.0
libtpu: 0.0.40
codegen_flags: <defaults>
</compile_context>

<pallas_src>
import math
from typing import Dict, NamedTuple

import jax
import jax.numpy as jnp
from jax import lax
from jax.experimental import pallas as pl
from jax.experimental.pallas import tpu as pltpu


def _round_up(x: int, m: int) -> int:
    return ((x + m - 1) // m) * m


def _vmem_capacity_bytes() -> int:
    """Physical per-core VMEM; conservative v7x fallback if the query fails."""
    try:
        cap = getattr(pltpu.get_tpu_info(), "vmem_capacity_bytes", None)
        if cap:
            return int(cap)
    except Exception:
        pass
    return 64 << 20          # v7x per-TensorCore VMEM (v5e/v6e have 128 MiB)


# ----------------------------------------------------------------------------
# Pallas kernel: batched row gather from a VMEM-resident packed table.
# ----------------------------------------------------------------------------
def _gather_kernel(ranks_ref, table_ref, out_ref):
    # ranks_ref: int32 SMEM ref; either this step's (G,) block (primary path)
    #            or the whole padded batch (scalar-prefetch fallback path).
    # table_ref: (V, P) packed parameter table, VMEM-resident across the grid.
    # out_ref:   (G, P) output block for rows [i*G, (i+1)*G).
    g, p = out_ref.shape
    row0 = 0 if ranks_ref.shape[0] == g else pl.program_id(0) * g
    sub = lax.broadcasted_iota(jnp.int32, (8, 1), 0)      # sublane ids 0..7

    def body8(b, carry):
        base = pl.multiple_of(b * 8, 8)
        # Pack 8 gathered rows into one dense (8, P) block in vregs, then issue
        # a single dense store (instead of 8 single-sublane masked stores).
        rows = jnp.broadcast_to(
            table_ref[pl.ds(ranks_ref[row0 + base], 1), :], (8, p))
        for j in range(1, 8):                              # statically unrolled
            r = table_ref[pl.ds(ranks_ref[row0 + base + j], 1), :]   # (1, P)
            rows = jnp.where(sub == j, r, rows)
        out_ref[pl.ds(base, 8), :] = rows
        return carry

    lax.fori_loop(0, g // 8, body8, 0)
    # TODO(synk): for very wide rows (P*itemsize >= ~16 KiB) per-row async
    # VMEM->VMEM copies (pltpu.make_async_copy + small semaphore pool) would
    # offload the gather to the DMA engine instead of vreg selects.


def _choose_rows_per_step(n: int, row_bytes: int) -> int:
    """Pick G (multiple of 8) that divides the padded batch when possible and
    yields >= 2 grid steps (v7x megacore), with bounded output block bytes."""
    n8 = _round_up(max(n, 1), 8)
    cap = min(256, max(8, ((4 << 20) // max(row_bytes, 1)) // 8 * 8))
    best = None
    g = 8
    while g <= min(cap, n8 // 2):
        if n8 % g == 0:
            best = g
        g += 8
    return best if best is not None else min(cap, n8)


def _gather_call(table, n_pad, G, *, blocked_ranks, single_buffer_table):
    V, P = table.shape
    itemsize = jnp.dtype(table.dtype).itemsize
    table_bytes = V * P * itemsize
    out_block_bytes = G * P * itemsize
    copies = 1 if single_buffer_table else 2
    need = copies * table_bytes + 2 * out_block_bytes
    vmem_cap = _vmem_capacity_bytes()
    vmem_limit = int(max(16 << 20, min(vmem_cap - (2 << 20), need + (4 << 20))))

    tbl_kwargs = {"pipeline_mode": pl.Buffered(1)} if single_buffer_table else {}
    if blocked_ranks:
        grid_spec = pltpu.PrefetchScalarGridSpec(
            num_scalar_prefetch=0,
            grid=(n_pad // G,),
            in_specs=[
                # Only this step's G ranks live in SMEM (constant SMEM use).
                pl.BlockSpec((G,), lambda i: (i,),
                             memory_space=pltpu.MemorySpace.SMEM),
                # Full table, constant block index -> VMEM-resident, never
                # re-DMA'd; single-buffered since it never changes.
                pl.BlockSpec((V, P), lambda i: (0, 0), **tbl_kwargs),
            ],
            out_specs=pl.BlockSpec((G, P), lambda i: (i, 0)),
        )
    else:
        # Fallback: whole padded ranks array scalar-prefetched into SMEM
        # (known-good configuration from the previous version).
        grid_spec = pltpu.PrefetchScalarGridSpec(
            num_scalar_prefetch=1,
            grid=(n_pad // G,),
            in_specs=[pl.BlockSpec((V, P), lambda i, r: (0, 0), **tbl_kwargs)],
            out_specs=pl.BlockSpec((G, P), lambda i, r: (i, 0)),
        )

    return pl.pallas_call(
        _gather_kernel,
        out_shape=jax.ShapeDtypeStruct((n_pad, P), table.dtype),
        grid_spec=grid_spec,
        compiler_params=pltpu.CompilerParams(
            dimension_semantics=("parallel",),     # disjoint output blocks
            vmem_limit_bytes=vmem_limit,
        ),
        cost_estimate=pl.CostEstimate(
            flops=0, transcendentals=0,
            bytes_accessed=int(table_bytes + n_pad * 4 + n_pad * P * itemsize)),
    )


def fire_embedding_gather(table: jnp.ndarray, ranks: jnp.ndarray,
                          *, rows_per_step: int | None = None) -> jnp.ndarray:
    """Gather rows `ranks` from `table` ((V, P) -> (n_pad, P)) with Pallas.

    Returns a row-padded array (n_pad = ceil(n / G) * G).  Callers should fold
    the [:n] un-padding into their downstream slices to avoid an extra copy.
    """
    n = ranks.shape[0]
    V, P = table.shape
    assert P % 128 == 0, "feature axis must be lane-aligned (multiple of 128)"
    itemsize = jnp.dtype(table.dtype).itemsize
    table_bytes = V * P * itemsize

    # VMEM-resident (single-buffered) table path, ceiling derived per chip.
    # TODO(synk): large-vocab fallback (HBM-resident table + manual per-row
    # DMA gather via memory_space=pl.ANY) when the table exceeds VMEM.
    assert table_bytes + (8 << 20) <= _vmem_capacity_bytes(), \
        "table too large for VMEM-resident path"

    if rows_per_step is None:
        rows_per_step = _choose_rows_per_step(n, P * itemsize)
    G = _round_up(rows_per_step, 8)
    n_pad = _round_up(max(n, 1), G)

    # Clamp ranks (no OOB dynamic reads) and pad the batch to a multiple of G.
    ranks = jnp.clip(ranks.astype(jnp.int32), 0, V - 1)
    if n_pad != n:
        ranks = jnp.pad(ranks, (0, n_pad - n))

    try:
        call = _gather_call(table, n_pad, G,
                            blocked_ranks=True, single_buffer_table=True)
        return call(ranks, table)
    except Exception:
        # Conservative known-good configuration (previous version's layout).
        call = _gather_call(table, n_pad, G,
                            blocked_ranks=False, single_buffer_table=False)
        return call(ranks, table)


# ----------------------------------------------------------------------------
# FireEmbedding (synthetic, deterministic parameters)
# ----------------------------------------------------------------------------
class FireTensor(NamedTuple):
    funcs: Dict[str, jnp.ndarray]      # sliced functional params, leading dim = n
    measures: Dict[str, jnp.ndarray]   # sliced measure params,    leading dim = n


class FireEmbeddingPallas:
    """JAX/Pallas re-implementation of FireEmbedding.forward.

    The stacked `funcs` (per-word 2-layer MLP R^dim -> R) and `measures`
    (K Dirac points per word) are represented by their stacked parameter
    tensors; forward(ranks) slices every parameter along the stacking axis.
    """

    def __init__(self, vocab_size: int, dim: int, hidden: int, k: int,
                 key: jax.Array):
        self.vocab_size = vocab_size
        self.dim = dim
        self.hidden = hidden
        self.k = k

        ks = jax.random.split(key, 6)
        # Functional (per-word 2-layer MLP) stacked parameters.
        self.func_params = {
            "w1": 0.1 * jax.random.normal(ks[0], (vocab_size, hidden, dim), jnp.float32),
            "b1": 0.1 * jax.random.normal(ks[1], (vocab_size, hidden), jnp.float32),
            "w2": 0.1 * jax.random.normal(ks[2], (vocab_size, 1, hidden), jnp.float32),
            "b2": 0.1 * jax.random.normal(ks[3], (vocab_size, 1), jnp.float32),
        }
        # Measure (per-word K Dirac points) stacked parameters.
        self.measure_params = {
            "x": jax.random.normal(ks[4], (vocab_size, k, dim), jnp.float32),
            "m": jax.random.normal(ks[5], (vocab_size, k), jnp.float32),
        }

        # Pack every per-word parameter into one (V, P) table.  Large segments
        # (>= 128 elements) get their own lane-aligned offset; small segments
        # are packed densely into shared 128-lane groups (no 127/128-wasted
        # lanes for a scalar bias).  Only the total width P is padded to 128.
        entries = []
        for is_func, params in ((True, self.func_params), (False, self.measure_params)):
            for name, p in params.items():
                shape = tuple(p.shape[1:])
                size = math.prod(shape) if shape else 1
                entries.append((is_func, name, p, shape, size))
        entries.sort(key=lambda e: e[4] < 128)     # stable: big segments first

        self._layout = []   # (name, per-word shape, lane offset, size, is_func)
        cols = []
        offset = 0
        for is_func, name, p, shape, size in entries:
            if size >= 128 and offset % 128 != 0:
                pad = _round_up(offset, 128) - offset
                cols.append(jnp.zeros((vocab_size, pad), jnp.float32))
                offset += pad
            self._layout.append((name, shape, offset, size, is_func))
            cols.append(p.reshape(vocab_size, size).astype(jnp.float32))
            offset += size
        P = _round_up(max(offset, 1), 128)
        if P != offset:
            cols.append(jnp.zeros((vocab_size, P - offset), jnp.float32))
        self.table = jnp.concatenate(cols, axis=1)     # (V, P), P % 128 == 0

    def __len__(self):
        return self.vocab_size

    def __call__(self, ranks: jnp.ndarray) -> FireTensor:
        n = ranks.shape[0]
        gathered = fire_embedding_gather(self.table, ranks)   # (n_pad, P)

        # Unpack into the individual sliced parameter tensors.  The row
        # un-padding ([:n]) is folded into each lax.slice so the padded gather
        # output is never re-copied wholesale.
        funcs, measures = {}, {}
        for name, shape, offset, size, is_func in self._layout:
            chunk = lax.slice(gathered, (0, offset), (n, offset + size))
            (funcs if is_func else measures)[name] = chunk.reshape((n,) + shape)
        return FireTensor(funcs=funcs, measures=measures)


# ----------------------------------------------------------------------------
if __name__ == "__main__":
    VOCAB, DIM, HIDDEN, K, N = 64, 4, 8, 4, 8

    root = jax.random.PRNGKey(0)
    k_params, k_ranks = jax.random.split(root)

    emb = FireEmbeddingPallas(vocab_size=VOCAB, dim=DIM, hidden=HIDDEN, k=K,
                              key=k_params)
    ranks = jax.random.randint(k_ranks, (N,), 0, VOCAB, dtype=jnp.int32)

    ft = emb(ranks)
    jax.block_until_ready(ft.funcs["w1"])
    jax.block_until_ready(ft.measures["x"])

    # Reference check: the forward is exactly a slice of every stacked param.
    ok = True
    for name, p in emb.func_params.items():
        ok &= bool(jnp.array_equal(ft.funcs[name], jnp.take(p, ranks, axis=0)))
    for name, p in emb.measure_params.items():
        ok &= bool(jnp.array_equal(ft.measures[name], jnp.take(p, ranks, axis=0)))
    assert ok, "Pallas gather does not match reference slicing"

    print("KERNEL_OK")
</pallas_src>

<mosaic_0001>
module attributes {stable_mosaic.version = 11 : i64} {
  func.func @_gather_kernel(%arg0: i32, %arg1: memref<8xi32, #tpu.memory_space<smem>>, %arg2: memref<64x128xf32, #tpu.memory_space<vmem>>, %arg3: memref<8x128xf32, #tpu.memory_space<vmem>>) attributes {dimension_semantics = [#tpu.dimension_semantics<parallel>], iteration_bounds = array<i64: 1>, scalar_prefetch = 1 : i64, scratch_operands = 0 : i64, tpu.core_type = #tpu.core_type<tc>, window_params = [{pipeline_mode = #tpu.pipeline_mode<synchronous>, transform_indices = @transform_0, window_bounds = array<i64: 64, 128>}, {transform_indices = @transform_1, window_bounds = array<i64: 8, 128>}]} {
    %0 = tpu.iota {dimensions = array<i32: 0>} : vector<8x1xi32>
    %c0_i32 = arith.constant 0 : i32
    %c8_i32 = arith.constant 8 : i32
    %1 = arith.muli %c0_i32, %c8_i32 : i32
    %2 = tpu.assume_multiple %1, 8 : i32
    %c0_i32_0 = arith.constant 0 : i32
    %3 = arith.addi %c0_i32_0, %2 : i32
    %4 = arith.index_cast %3 : i32 to index
    %5 = memref.load %arg1[%4] : memref<8xi32, #tpu.memory_space<smem>>
    %6 = arith.index_cast %5 : i32 to index
    %c0 = arith.constant 0 : index
    %7 = vector.load %arg2[%6, %c0] : memref<64x128xf32, #tpu.memory_space<vmem>>, vector<1x128xf32>
    %8 = vector.shape_cast %7 : vector<1x128xf32> to vector<1x128xf32>
    %9 = vector.broadcast %8 : vector<1x128xf32> to vector<8x128xf32>
    %c0_i32_1 = arith.constant 0 : i32
    %10 = arith.addi %c0_i32_1, %2 : i32
    %c1_i32 = arith.constant 1 : i32
    %11 = arith.addi %10, %c1_i32 : i32
    %12 = arith.index_cast %11 : i32 to index
    %13 = memref.load %arg1[%12] : memref<8xi32, #tpu.memory_space<smem>>
    %14 = arith.index_cast %13 : i32 to index
    %c0_2 = arith.constant 0 : index
    %15 = vector.load %arg2[%14, %c0_2] : memref<64x128xf32, #tpu.memory_space<vmem>>, vector<1x128xf32>
    %c1_i32_3 = arith.constant 1 : i32
    %16 = vector.broadcast %c1_i32_3 : i32 to vector<8x1xi32>
    %17 = arith.cmpi eq, %0, %16 : vector<8x1xi32>
    %18 = vector.shape_cast %17 : vector<8x1xi1> to vector<8x1xi1>
    %19 = vector.broadcast %18 : vector<8x1xi1> to vector<8x128xi1>
    %20 = vector.shape_cast %15 : vector<1x128xf32> to vector<1x128xf32>
    %21 = vector.broadcast %20 : vector<1x128xf32> to vector<8x128xf32>
    %22 = arith.select %19, %21, %9 : vector<8x128xi1>, vector<8x128xf32>
    %c0_i32_4 = arith.constant 0 : i32
    %23 = arith.addi %c0_i32_4, %2 : i32
    %c2_i32 = arith.constant 2 : i32
    %24 = arith.addi %23, %c2_i32 : i32
    %25 = arith.index_cast %24 : i32 to index
    %26 = memref.load %arg1[%25] : memref<8xi32, #tpu.memory_space<smem>>
    %27 = arith.index_cast %26 : i32 to index
    %c0_5 = arith.constant 0 : index
    %28 = vector.load %arg2[%27, %c0_5] : memref<64x128xf32, #tpu.memory_space<vmem>>, vector<1x128xf32>
    %c2_i32_6 = arith.constant 2 : i32
    %29 = vector.broadcast %c2_i32_6 : i32 to vector<8x1xi32>
    %30 = arith.cmpi eq, %0, %29 : vector<8x1xi32>
    %31 = vector.shape_cast %30 : vector<8x1xi1> to vector<8x1xi1>
    %32 = vector.broadcast %31 : vector<8x1xi1> to vector<8x128xi1>
    %33 = vector.shape_cast %28 : vector<1x128xf32> to vector<1x128xf32>
    %34 = vector.broadcast %33 : vector<1x128xf32> to vector<8x128xf32>
    %35 = arith.select %32, %34, %22 : vector<8x128xi1>, vector<8x128xf32>
    %c0_i32_7 = arith.constant 0 : i32
    %36 = arith.addi %c0_i32_7, %2 : i32
    %c3_i32 = arith.constant 3 : i32
    %37 = arith.addi %36, %c3_i32 : i32
    %38 = arith.index_cast %37 : i32 to index
    %39 = memref.load %arg1[%38] : memref<8xi32, #tpu.memory_space<smem>>
    %40 = arith.index_cast %39 : i32 to index
    %c0_8 = arith.constant 0 : index
    %41 = vector.load %arg2[%40, %c0_8] : memref<64x128xf32, #tpu.memory_space<vmem>>, vector<1x128xf32>
    %c3_i32_9 = arith.constant 3 : i32
    %42 = vector.broadcast %c3_i32_9 : i32 to vector<8x1xi32>
    %43 = arith.cmpi eq, %0, %42 : vector<8x1xi32>
    %44 = vector.shape_cast %43 : vector<8x1xi1> to vector<8x1xi1>
    %45 = vector.broadcast %44 : vector<8x1xi1> to vector<8x128xi1>
    %46 = vector.shape_cast %41 : vector<1x128xf32> to vector<1x128xf32>
    %47 = vector.broadcast %46 : vector<1x128xf32> to vector<8x128xf32>
    %48 = arith.select %45, %47, %35 : vector<8x128xi1>, vector<8x128xf32>
    %c0_i32_10 = arith.constant 0 : i32
    %49 = arith.addi %c0_i32_10, %2 : i32
    %c4_i32 = arith.constant 4 : i32
    %50 = arith.addi %49, %c4_i32 : i32
    %51 = arith.index_cast %50 : i32 to index
    %52 = memref.load %arg1[%51] : memref<8xi32, #tpu.memory_space<smem>>
    %53 = arith.index_cast %52 : i32 to index
    %c0_11 = arith.constant 0 : index
    %54 = vector.load %arg2[%53, %c0_11] : memref<64x128xf32, #tpu.memory_space<vmem>>, vector<1x128xf32>
    %c4_i32_12 = arith.constant 4 : i32
    %55 = vector.broadcast %c4_i32_12 : i32 to vector<8x1xi32>
    %56 = arith.cmpi eq, %0, %55 : vector<8x1xi32>
    %57 = vector.shape_cast %56 : vector<8x1xi1> to vector<8x1xi1>
    %58 = vector.broadcast %57 : vector<8x1xi1> to vector<8x128xi1>
    %59 = vector.shape_cast %54 : vector<1x128xf32> to vector<1x128xf32>
    %60 = vector.broadcast %59 : vector<1x128xf32> to vector<8x128xf32>
    %61 = arith.select %58, %60, %48 : vector<8x128xi1>, vector<8x128xf32>
    %c0_i32_13 = arith.constant 0 : i32
    %62 = arith.addi %c0_i32_13, %2 : i32
    %c5_i32 = arith.constant 5 : i32
    %63 = arith.addi %62, %c5_i32 : i32
    %64 = arith.index_cast %63 : i32 to index
    %65 = memref.load %arg1[%64] : memref<8xi32, #tpu.memory_space<smem>>
    %66 = arith.index_cast %65 : i32 to index
    %c0_14 = arith.constant 0 : index
    %67 = vector.load %arg2[%66, %c0_14] : memref<64x128xf32, #tpu.memory_space<vmem>>, vector<1x128xf32>
    %c5_i32_15 = arith.constant 5 : i32
    %68 = vector.broadcast %c5_i32_15 : i32 to vector<8x1xi32>
    %69 = arith.cmpi eq, %0, %68 : vector<8x1xi32>
    %70 = vector.shape_cast %69 : vector<8x1xi1> to vector<8x1xi1>
    %71 = vector.broadcast %70 : vector<8x1xi1> to vector<8x128xi1>
    %72 = vector.shape_cast %67 : vector<1x128xf32> to vector<1x128xf32>
    %73 = vector.broadcast %72 : vector<1x128xf32> to vector<8x128xf32>
    %74 = arith.select %71, %73, %61 : vector<8x128xi1>, vector<8x128xf32>
    %c0_i32_16 = arith.constant 0 : i32
    %75 = arith.addi %c0_i32_16, %2 : i32
    %c6_i32 = arith.constant 6 : i32
    %76 = arith.addi %75, %c6_i32 : i32
    %77 = arith.index_cast %76 : i32 to index
    %78 = memref.load %arg1[%77] : memref<8xi32, #tpu.memory_space<smem>>
    %79 = arith.index_cast %78 : i32 to index
    %c0_17 = arith.constant 0 : index
    %80 = vector.load %arg2[%79, %c0_17] : memref<64x128xf32, #tpu.memory_space<vmem>>, vector<1x128xf32>
    %c6_i32_18 = arith.constant 6 : i32
    %81 = vector.broadcast %c6_i32_18 : i32 to vector<8x1xi32>
    %82 = arith.cmpi eq, %0, %81 : vector<8x1xi32>
    %83 = vector.shape_cast %82 : vector<8x1xi1> to vector<8x1xi1>
    %84 = vector.broadcast %83 : vector<8x1xi1> to vector<8x128xi1>
    %85 = vector.shape_cast %80 : vector<1x128xf32> to vector<1x128xf32>
    %86 = vector.broadcast %85 : vector<1x128xf32> to vector<8x128xf32>
    %87 = arith.select %84, %86, %74 : vector<8x128xi1>, vector<8x128xf32>
    %c0_i32_19 = arith.constant 0 : i32
    %88 = arith.addi %c0_i32_19, %2 : i32
    %c7_i32 = arith.constant 7 : i32
    %89 = arith.addi %88, %c7_i32 : i32
    %90 = arith.index_cast %89 : i32 to index
    %91 = memref.load %arg1[%90] : memref<8xi32, #tpu.memory_space<smem>>
    %92 = arith.index_cast %91 : i32 to index
    %c0_20 = arith.constant 0 : index
    %93 = vector.load %arg2[%92, %c0_20] : memref<64x128xf32, #tpu.memory_space<vmem>>, vector<1x128xf32>
    %c7_i32_21 = arith.constant 7 : i32
    %94 = vector.broadcast %c7_i32_21 : i32 to vector<8x1xi32>
    %95 = arith.cmpi eq, %0, %94 : vector<8x1xi32>
    %96 = vector.shape_cast %95 : vector<8x1xi1> to vector<8x1xi1>
    %97 = vector.broadcast %96 : vector<8x1xi1> to vector<8x128xi1>
    %98 = vector.shape_cast %93 : vector<1x128xf32> to vector<1x128xf32>
    %99 = vector.broadcast %98 : vector<1x128xf32> to vector<8x128xf32>
    %100 = arith.select %97, %99, %87 : vector<8x128xi1>, vector<8x128xf32>
    %101 = arith.index_cast %2 : i32 to index
    %c0_22 = arith.constant 0 : index
    %102 = vector.load %arg3[%101, %c0_22] : memref<8x128xf32, #tpu.memory_space<vmem>>, vector<8x128xf32>
    tpu.vector_store %arg3[%101, %c0_22], %100 {strides = array<i32>} : memref<8x128xf32, #tpu.memory_space<vmem>>, vector<8x128xf32>,
    %c1_i32_23 = arith.constant 1 : i32
    return
  }
  func.func @transform_0(%arg0: i32, %arg1: memref<8xi32, #tpu.memory_space<smem>>) -> (i32, i32) {
    %c0_i32 = arith.constant 0 : i32
    %c0_i32_0 = arith.constant 0 : i32
    %c0_i32_1 = arith.constant 0 : i32
    return %c0_i32, %c0_i32_0 : i32, i32
  }
  func.func @transform_1(%arg0: i32, %arg1: memref<8xi32, #tpu.memory_space<smem>>) -> (i32, i32) {
    %c0_i32 = arith.constant 0 : i32
    %c0_i32_0 = arith.constant 0 : i32
    return %arg0, %c0_i32 : i32, i32
  }
}

</mosaic_0001>

<bundles_post_ra>
// kernel: tpu_custom_call.1
= control target key start
LH: loop header
LB: loop body
LE: loop exit
PB: predicated region body
PF: predicated region fallthrough
CT: control target
= control target key end

     0   :  { %s283_s0 = inlined_call_operand.hbm [shape: s32[8], index: 0, kind: input, shape index: {}]   ;;  %s284_s1 = inlined_call_operand.hbm [shape: f32[64,128], index: 1, kind: input, shape index: {}]   ;;  %s285_s2 = inlined_call_operand.hbm [shape: f32[8,128], index: 2, kind: output, shape index: {}]  }
   0x1   :  { %s165_s11 = scalar_lea.hbm %s283_s0, 16 }
   0x2   :  { %p166_p0 = scmp.ne.s32.totalorder %s283_s0, %s165_s11  ;;  %p169_p1 = scmp.lt.u32.totalorder %s165_s11, %s283_s0 }
   0x4   :  { %p171_p2 = pnand %p169_p1, %p166_p0 }
   0x6   :  { %174 = shalt.err (!%p171_p2)  }
   0x7   :  { %s225_s16 = smov [#allocation3]  }
   0x8   :  { %8 = dma.hbm_to_smem %s283_s0, 16, %s225_s16, [#allocation2] }
   0x9   :  { %219 = dma.done.wait [#allocation2], 16 }
   0xa   :  { %220 = vsyncadd [#allocation2], 4294967280 }
   0xb   :  { %10 = sfence }
   0xc   :  { %11 = vsyncpa [#allocation5], 0 }
   0xd   :  { %12 = vsyncpa [#allocation6], 0  ;;  %s226_s19 = smov [#allocation4]   ;;  %s175_s23 = scalar_lea.hbm %s284_s1, 1024 }
   0xe   :  { %s18_s20 = sshll.u32 %s226_s19, 4  ;;  %p176_p3 = scmp.ne.s32.totalorder %s284_s1, %s175_s23  ;;  %s19_s20 = int_to_ptr.vmem [resolvable:$true] %s18_s20 }
   0xf   :  { %p179_p4 = scmp.lt.u32.totalorder %s175_s23, %s284_s1 }
  0x11   :  { %p181_p5 = pnand %p179_p4, %p176_p3 }
  0x13   :  { %184 = shalt.err (!%p181_p5)
}
  0x14   :  { %s185_s0 = scalar_lea.vmem %s19_s20, 1024  ;;  %p190_p7 = scmp.lt.s32.totalorder %s19_s20, %s19_s20 }
  0x15   :  { %p186_p6 = scmp.ne.s32.totalorder %s19_s20, %s185_s0  ;;  %p191_p8 = scmp.lt.s32.totalorder %s185_s0, %s185_s0 }
  0x17   :  { %p192_p9 = por %p191_p8, %p190_p7 }
  0x19   :  { %p193_p10 = pnand %p192_p9, %p186_p6 }
  0x1b   :  { %196 = shalt.err (!%p193_p10)
}
  0x1c   :  { %s227_s28 = smov 128   ;;  %s228_s29 = smov 8  }
  0x1d   :  { %24 = dma.hbm_to_vmem [thread:$0]  %s284_s1, 1024, %s19_s20, [#allocation5], %s227_s28, %s227_s28, %s228_s29  }
  0x1e   :  { %221 = dma.done.wait [#allocation5], 1024  }
  0x1f   :  { %222 = vsyncadd [#allocation5], 4294966272  ;;  %v28_v0 = vlaneseq  ;;  %s30_s4 = sld [smem:[#allocation3]]  ;;  %s146_s5 = sld [smem:[#allocation3 + $0x1]] }
  0x20   :  { %s148_s6 = sld [smem:[#allocation3 + $0x2]]  ;;  %s150_s7 = sld [smem:[#allocation3 + $0x3]] }
  0x21   :  { %v29_v1 = vshrl.u32 %v28_v0, 7  ;;  %s152_s8 = sld [smem:[#allocation3 + $0x4]]  ;;  %s154_s9 = sld [smem:[#allocation3 + $0x5]] }
  0x22   :  { %s156_s10 = sld [smem:[#allocation3 + $0x6]]  ;;  %s158_s11 = sld [smem:[#allocation3 + $0x7]] }
  0x23   :  { %vm41_vm0 = vcmp.eq.s32.totalorder %v29_v1, 1  ;;  %vm53_vm1 = vcmp.eq.s32.totalorder %v29_v1, 2  ;;  %vm65_vm2 = vcmp.eq.s32.totalorder %v29_v1, 3  ;;  %vm77_vm3 = vcmp.eq.s32.totalorder %v29_v1, 4  ;;  %s229_s18 = smov [#allocation7]  }
  0x24   :  { %vm89_vm4 = vcmp.eq.s32.totalorder %v29_v1, 5  ;;  %vm101_vm5 = vcmp.eq.s32.totalorder %v29_v1, 6  ;;  %s128_s19 = sshll.u32 %s229_s18, 4  ;;  %vm113_vm6 = vcmp.eq.s32.totalorder %v29_v1, 7  ;;  %s129_s19 = int_to_ptr.vmem [resolvable:$true] %s128_s19 }
  0x25   :  { %s31_s12 = scalar_lea.vmem [#allocation4], %s30_s4  ;;  %s39_s13 = scalar_lea.vmem [#allocation4], %s146_s5 }
  0x26   :  { %v145_v2 = vld [vmem:[%s31_s12] ss:$0 sm:$0xff]  ;;  %s51_s1 = scalar_lea.vmem [#allocation4], %s148_s6  ;;  %s63_s14 = scalar_lea.vmem [#allocation4], %s150_s7 }
  0x27   :  { %v147_v3 = vld [vmem:[%s39_s13] ss:$0 sm:$0xff]  ;;  %s75_s15 = scalar_lea.vmem [#allocation4], %s152_s8  ;;  %s87_s16 = scalar_lea.vmem [#allocation4], %s154_s9 }
  0x28   :  { %v48_v4 = vsel %vm41_vm0, %v147_v3, %v145_v2  ;;  %v149_v5 = vld [vmem:[%s51_s1] ss:$0 sm:$0xff]  ;;  %s99_s17 = scalar_lea.vmem [#allocation4], %s156_s10  ;;  %s111_s20 = scalar_lea.vmem [#allocation4], %s158_s11 }
  0x29   :  { %v151_v6 = vld [vmem:[%s63_s14] ss:$0 sm:$0xff]  ;;  %v60_v7 = vsel %vm53_vm1, %v149_v5, %v48_v4  ;;  %s197_s21 = scalar_lea.vmem %s129_s19, 128  ;;  %p202_p12 = scmp.lt.s32.totalorder %s129_s19, %s129_s19 }
  0x2a   :  { %v153_v8 = vld [vmem:[%s75_s15] ss:$0 sm:$0xff]  ;;  %v72_v10 = vsel %vm65_vm2, %v151_v6, %v60_v7  ;;  %p198_p11 = scmp.ne.s32.totalorder %s129_s19, %s197_s21  ;;  %p203_p13 = scmp.lt.s32.totalorder %s197_s21, %s197_s21 }
  0x2b   :  { %v155_v9 = vld [vmem:[%s87_s16] ss:$0 sm:$0xff]  ;;  %v84_v12 = vsel %vm77_vm3, %v153_v8, %v72_v10 }
  0x2c   :  { %v157_v11 = vld [vmem:[%s99_s17] ss:$0 sm:$0xff]  ;;  %v96_v14 = vsel %vm89_vm4, %v155_v9, %v84_v12  ;;  %p204_p0 = por %p203_p13, %p202_p12 }
  0x2d   :  { %v159_v13 = vld [vmem:[%s111_s20] ss:$0 sm:$0xff]  ;;  %v108_v15 = vsel %vm101_vm5, %v157_v11, %v96_v14 }
  0x2e   :  { %v120_v16 = vsel %vm113_vm6, %v159_v13, %v108_v15  ;;  %p205_p1 = pnand %p204_p0, %p198_p11 }
  0x2f   :  { %121 = vst [vmem:[#allocation7] sm:$0xff] %v120_v16 }
  0x30   :  { %208 = shalt.err (!%p205_p1)
}
  0x31   :  { %s209_s24 = scalar_lea.hbm %s285_s2, 128 }
  0x32   :  { %p210_p2 = scmp.ne.s32.totalorder %s285_s2, %s209_s24  ;;  %p213_p3 = scmp.lt.u32.totalorder %s209_s24, %s285_s2 }
  0x34   :  { %p215_p4 = pnand %p213_p3, %p210_p2 }
  0x36   :  { %218 = shalt.err (!%p215_p4)
}
  0x37   :  { %131 = dma.vmem_to_hbm [thread:$0]  %s129_s19, 128, %s285_s2, [#allocation6]  }
  0x38   :  { %223 = dma.done.wait [#allocation6], 128  }
  0x39   :  { %224 = vsyncadd [#allocation6], 4294967168 }
  0x3a   :  { %135 = vsyncpa [#allocation5], 1 }
  0x3b   :  { %136 = vsyncpa [#allocation6], 1 }

</bundles_post_ra>
